<compile_context>
chip_gen: v6e
topology: v6e:2x2x1
jax: 0.10.0
libtpu: 0.0.40
codegen_flags: <defaults>
</compile_context>

<pallas_src>
import jax
import jax.numpy as jnp
from jax import lax
from jax.experimental import pallas as pl
from jax.experimental.pallas import tpu as pltpu


def _round_up(x, m):
    return ((x + m - 1) // m) * m


def _make_risk_sum_kernel(chunk):
    """Kernel computing out[i] = sum_j [T[i] < T[j]] * exp(P[j]) per row tile."""

    def kernel(t_col_ref, t_row_ref, p_exp_row_ref, out_ref, acc_ref):
        t_col = t_col_ref[...]                           # (tm, 1)
        acc_ref[...] = jnp.zeros_like(acc_ref)           # (tm, 128) lane-dense acc

        n_pad = t_row_ref.shape[1]
        n_chunks = n_pad // chunk

        def body(c, carry):
            j = pl.multiple_of(c * chunk, 128)
            t_row = t_row_ref[:, pl.ds(j, chunk)]        # (1, chunk)
            p_row = p_exp_row_ref[:, pl.ds(j, chunk)]    # (1, chunk)
            # Fused mask * exp(P): one compare + one select per vreg.
            contrib = jnp.where(t_col < t_row, p_row, 0.0)   # (tm, chunk)
            # Fold the chunk's 128-lane groups with aligned static slices
            # (pure VPU adds, no cross-lane work, no relayout).
            part = contrib[:, 0:128]
            for s in range(1, chunk // 128):
                part = part + contrib[:, s * 128:(s + 1) * 128]
            acc_ref[...] += part
            return carry

        lax.fori_loop(0, n_chunks, body, 0)

        # Single deferred cross-lane reduce + lane-sparse store per row tile.
        out_ref[...] = jnp.sum(acc_ref[...], axis=1, keepdims=True)

    return kernel


def deepsurv_loss(P_risk, T, E, *, tm=512, chunk=512):
    """Pallas implementation of DeepSurvLoss.forward(P_risk, T, E) -> scalar."""
    assert chunk % 128 == 0 and tm % 8 == 0

    P = P_risk.astype(jnp.float32).reshape(-1)
    T = T.astype(jnp.float32).reshape(-1)
    E = E.astype(jnp.float32).reshape(-1)
    n = P.shape[0]

    # exp(P) computed exactly once; reused by the kernel and the epilogue.
    # (Unguarded exp matches the PyTorch reference; large logits overflow.)
    P_exp = jnp.exp(P)

    # Pad N up to a multiple of the chunk width.  Padded T is -inf so padded
    # columns never satisfy T[i] < T[j]; padded rows are sliced off below.
    n_pad = _round_up(max(n, chunk), chunk)
    pad = n_pad - n
    t_pad = jnp.pad(T, (0, pad), constant_values=float("-inf"))
    p_exp_pad = jnp.pad(P_exp, (0, pad), constant_values=0.0)

    # Row tile: big enough to amortize the grid-step overhead, small enough to
    # keep >= 2 row tiles when n allows it (both v7x TensorCores get work).
    tm_eff = None
    for cand in (512, 256, 128):
        if cand <= tm and n_pad % cand == 0 and n_pad // cand >= 2:
            tm_eff = cand
            break
    if tm_eff is None:  # tiny user tm override / degenerate sizes
        tm_eff = 8
        while tm_eff * 2 <= min(tm, n_pad) and n_pad % (tm_eff * 2) == 0:
            tm_eff *= 2
    grid_rows = n_pad // tm_eff

    t_col = t_pad.reshape(n_pad, 1)
    t_row = t_pad.reshape(1, n_pad)
    p_exp_row = p_exp_pad.reshape(1, n_pad)

    # VMEM budget from the actual buffers (double-buffered blocks + scratch +
    # headroom for the (tm, chunk) select intermediate); capped < 64 MiB (v7x).
    vmem_est = (
        2 * (2 * n_pad * 4)          # T-row + exp(P)-row blocks
        + 2 * (2 * tm_eff * 4)       # T-col + out (tm, 1) blocks
        + tm_eff * 128 * 4           # lane-dense accumulator scratch
        + 2 * tm_eff * chunk * 4     # select / partial-sum intermediates
    )
    vmem_limit = int(min(48 * 1024 * 1024, max(4 * 1024 * 1024, 2 * vmem_est)))

    p_exp_sum = pl.pallas_call(
        _make_risk_sum_kernel(chunk),
        out_shape=jax.ShapeDtypeStruct((n_pad, 1), jnp.float32),
        grid_spec=pltpu.PrefetchScalarGridSpec(
            num_scalar_prefetch=0,
            grid=(grid_rows,),
            in_specs=[
                pl.BlockSpec((tm_eff, 1), lambda i: (i, 0)),   # T as column (rows of M)
                pl.BlockSpec((1, n_pad), lambda i: (0, 0)),    # T as full row (cols of M)
                pl.BlockSpec((1, n_pad), lambda i: (0, 0)),    # exp(P) as full row
            ],
            out_specs=pl.BlockSpec((tm_eff, 1), lambda i: (i, 0)),
            scratch_shapes=[pltpu.VMEM((tm_eff, 128), jnp.float32)],
        ),
        compiler_params=pltpu.CompilerParams(
            dimension_semantics=("parallel",),
            vmem_limit_bytes=vmem_limit,
        ),
    )(t_col, t_row, p_exp_row)

    p_exp_sum = p_exp_sum[:n, 0]

    # O(N) epilogue in plain JAX (lane-sparse work; keeps reference semantics
    # exactly, including the global clip-max over all rows).
    has_risk = (T < jnp.max(T)).astype(jnp.float32)   # == (M.sum(axis=1) > 0)
    e_eff = E * has_risk                              # mode == 'risk'
    p_tmp = P_exp / (p_exp_sum + 1e-6)
    p_clip = jnp.clip(p_tmp, 1e-6, jnp.max(p_tmp))
    # NOTE: if sum(e_eff) == 0 this returns NaN, matching the PyTorch reference.
    return -jnp.sum(jnp.log(p_clip) * e_eff) / jnp.sum(e_eff)


def _deepsurv_loss_ref(P_risk, T, E):
    """Pure-JAX reference mirroring the PyTorch module (for verification)."""
    P = P_risk.astype(jnp.float32)
    T = T.astype(jnp.float32)
    E = E.astype(jnp.float32)
    P_exp = jnp.exp(P)
    M = (T[:, None] < T[None, :]).astype(jnp.float32)
    E_eff = E * (jnp.sum(M, axis=1) > 0).astype(jnp.float32)
    P_exp_sum = jnp.sum(M * P_exp[None, :], axis=1)
    P_tmp = P_exp / (P_exp_sum + 1e-6)
    P_clip = jnp.clip(P_tmp, 1e-6, jnp.max(P_tmp))
    return -jnp.sum(jnp.log(P_clip) * E_eff) / jnp.sum(E_eff)


if __name__ == "__main__":
    key = jax.random.PRNGKey(0)

    # Small case (single chunk, two row tiles after padding).
    k1, k2, k3 = jax.random.split(key, 3)
    N = 8
    P_risk = jax.random.normal(k1, (N,), dtype=jnp.float32)
    T = jax.random.uniform(k2, (N,), dtype=jnp.float32) * 10.0
    E = (jax.random.uniform(k3, (N,)) > 0.3).astype(jnp.int32)
    E = E.at[jnp.argmin(T)].set(1)  # guarantee a non-degenerate loss

    loss = deepsurv_loss(P_risk, T, E)
    jax.block_until_ready(loss)
    ref = _deepsurv_loss_ref(P_risk, T, E)
    assert jnp.allclose(loss, ref, rtol=1e-5, atol=1e-5), (loss, ref)

    # Larger case exercising padding, multiple chunks and multiple row tiles.
    k4, k5, k6 = jax.random.split(jax.random.PRNGKey(1), 3)
    N2 = 1300
    P2 = jax.random.normal(k4, (N2,), dtype=jnp.float32)
    T2 = jax.random.uniform(k5, (N2,), dtype=jnp.float32) * 10.0
    E2 = (jax.random.uniform(k6, (N2,)) > 0.3).astype(jnp.int32)
    E2 = E2.at[jnp.argmin(T2)].set(1)

    loss2 = deepsurv_loss(P2, T2, E2)
    jax.block_until_ready(loss2)
    ref2 = _deepsurv_loss_ref(P2, T2, E2)
    assert jnp.allclose(loss2, ref2, rtol=1e-5, atol=1e-5), (loss2, ref2)

    print("KERNEL_OK")
</pallas_src>

<mosaic_0001>
module attributes {stable_mosaic.version = 11 : i64} {
  func.func @kernel(%arg0: i32, %arg1: memref<256x1xf32, #tpu.memory_space<vmem>>, %arg2: memref<1x512xf32, #tpu.memory_space<vmem>>, %arg3: memref<1x512xf32, #tpu.memory_space<vmem>>, %arg4: memref<256x1xf32, #tpu.memory_space<vmem>>, %arg5: memref<256x128xf32, #tpu.memory_space<vmem>>) attributes {dimension_semantics = [#tpu.dimension_semantics<parallel>], iteration_bounds = array<i64: 2>, scalar_prefetch = 0 : i64, scratch_operands = 1 : i64, tpu.core_type = #tpu.core_type<tc>, window_params = [{transform_indices = @transform_0, window_bounds = array<i64: 256, 1>}, {pipeline_mode = #tpu.pipeline_mode<synchronous>, transform_indices = @transform_1, window_bounds = array<i64: 1, 512>}, {pipeline_mode = #tpu.pipeline_mode<synchronous>, transform_indices = @transform_2, window_bounds = array<i64: 1, 512>}, {transform_indices = @transform_3, window_bounds = array<i64: 256, 1>}]} {
    %c0 = arith.constant 0 : index
    %c0_0 = arith.constant 0 : index
    %0 = vector.load %arg1[%c0, %c0_0] : memref<256x1xf32, #tpu.memory_space<vmem>>, vector<256x1xf32>
    %cst = arith.constant 0.000000e+00 : f32
    %1 = vector.broadcast %cst : f32 to vector<256x128xf32>
    %c0_1 = arith.constant 0 : index
    %c0_2 = arith.constant 0 : index
    %2 = vector.load %arg5[%c0_1, %c0_2] : memref<256x128xf32, #tpu.memory_space<vmem>>, vector<256x128xf32>
    tpu.vector_store %arg5[%c0_1, %c0_2], %1 {strides = array<i32>} : memref<256x128xf32, #tpu.memory_space<vmem>>, vector<256x128xf32>,
    %c0_i32 = arith.constant 0 : i32
    %c512_i32 = arith.constant 512 : i32
    %3 = arith.muli %c0_i32, %c512_i32 : i32
    %4 = tpu.assume_multiple %3, 128 : i32
    %c0_3 = arith.constant 0 : index
    %5 = arith.index_cast %4 : i32 to index
    %6 = vector.load %arg2[%c0_3, %5] : memref<1x512xf32, #tpu.memory_space<vmem>>, vector<1x512xf32>
    %c0_4 = arith.constant 0 : index
    %7 = arith.index_cast %4 : i32 to index
    %8 = vector.load %arg3[%c0_4, %7] : memref<1x512xf32, #tpu.memory_space<vmem>>, vector<1x512xf32>
    %9 = vector.broadcast %0 : vector<256x1xf32> to vector<256x512xf32>
    %10 = vector.broadcast %6 : vector<1x512xf32> to vector<256x512xf32>
    %11 = arith.cmpf olt, %9, %10 : vector<256x512xf32>
    %cst_5 = arith.constant 0.000000e+00 : f32
    %12 = vector.shape_cast %8 : vector<1x512xf32> to vector<1x512xf32>
    %13 = vector.broadcast %12 : vector<1x512xf32> to vector<256x512xf32>
    %14 = vector.broadcast %cst_5 : f32 to vector<256x512xf32>
    %15 = arith.select %11, %13, %14 : vector<256x512xi1>, vector<256x512xf32>
    %16 = vector.extract_strided_slice %15 {offsets = [0, 0], sizes = [256, 128], strides = [1, 1]} : vector<256x512xf32> to vector<256x128xf32>
    %17 = vector.extract_strided_slice %15 {offsets = [0, 128], sizes = [256, 128], strides = [1, 1]} : vector<256x512xf32> to vector<256x128xf32>
    %18 = arith.addf %16, %17 : vector<256x128xf32>
    %19 = vector.extract_strided_slice %15 {offsets = [0, 256], sizes = [256, 128], strides = [1, 1]} : vector<256x512xf32> to vector<256x128xf32>
    %20 = arith.addf %18, %19 : vector<256x128xf32>
    %21 = vector.extract_strided_slice %15 {offsets = [0, 384], sizes = [256, 128], strides = [1, 1]} : vector<256x512xf32> to vector<256x128xf32>
    %22 = arith.addf %20, %21 : vector<256x128xf32>
    %c0_6 = arith.constant 0 : index
    %c0_7 = arith.constant 0 : index
    %23 = vector.load %arg5[%c0_6, %c0_7] : memref<256x128xf32, #tpu.memory_space<vmem>>, vector<256x128xf32>
    %24 = arith.addf %23, %22 : vector<256x128xf32>
    %c0_8 = arith.constant 0 : index
    %c0_9 = arith.constant 0 : index
    %25 = vector.load %arg5[%c0_8, %c0_9] : memref<256x128xf32, #tpu.memory_space<vmem>>, vector<256x128xf32>
    tpu.vector_store %arg5[%c0_8, %c0_9], %24 {strides = array<i32>} : memref<256x128xf32, #tpu.memory_space<vmem>>, vector<256x128xf32>,
    %c1_i32 = arith.constant 1 : i32
    %c0_10 = arith.constant 0 : index
    %c0_11 = arith.constant 0 : index
    %26 = vector.load %arg5[%c0_10, %c0_11] : memref<256x128xf32, #tpu.memory_space<vmem>>, vector<256x128xf32>
    %cst_12 = arith.constant dense<0.000000e+00> : vector<256xf32>
    %27 = vector.multi_reduction <add>, %26, %cst_12 [1] : vector<256x128xf32> to vector<256xf32>
    %28 = vector.shape_cast %27 : vector<256xf32> to vector<256x1xf32>
    %c0_13 = arith.constant 0 : index
    %c0_14 = arith.constant 0 : index
    %29 = vector.load %arg4[%c0_13, %c0_14] : memref<256x1xf32, #tpu.memory_space<vmem>>, vector<256x1xf32>
    tpu.vector_store %arg4[%c0_13, %c0_14], %28 {strides = array<i32>} : memref<256x1xf32, #tpu.memory_space<vmem>>, vector<256x1xf32>,
    return
  }
  func.func @transform_0(%arg0: i32) -> (i32, i32) {
    %c0_i32 = arith.constant 0 : i32
    %c0_i32_0 = arith.constant 0 : i32
    return %arg0, %c0_i32 : i32, i32
  }
  func.func @transform_1(%arg0: i32) -> (i32, i32) {
    %c0_i32 = arith.constant 0 : i32
    %c0_i32_0 = arith.constant 0 : i32
    %c0_i32_1 = arith.constant 0 : i32
    return %c0_i32, %c0_i32_0 : i32, i32
  }
  func.func @transform_2(%arg0: i32) -> (i32, i32) {
    %c0_i32 = arith.constant 0 : i32
    %c0_i32_0 = arith.constant 0 : i32
    %c0_i32_1 = arith.constant 0 : i32
    return %c0_i32, %c0_i32_0 : i32, i32
  }
  func.func @transform_3(%arg0: i32) -> (i32, i32) {
    %c0_i32 = arith.constant 0 : i32
    %c0_i32_0 = arith.constant 0 : i32
    return %arg0, %c0_i32 : i32, i32
  }
}

</mosaic_0001>

<bundles_post_ra>
// kernel: tpu_custom_call.1
= control target key start
LH: loop header
LB: loop body
LE: loop exit
PB: predicated region body
PF: predicated region fallthrough
CT: control target
= control target key end

     0   :  { %s1126_s12 = smov 0   ;;  %s1873_s0 = inlined_call_operand.vmem [shape: f32[512,1], index: 0, kind: input, shape index: {}]   ;;  %s1874_s1 = inlined_call_operand.vmem [shape: f32[1,512], index: 1, kind: input, shape index: {}]   ;;  %s1875_s2 = inlined_call_operand.vmem [shape: f32[1,512], index: 2, kind: input, shape index: {}]   ;;  %s1876_s3 = inlined_call_operand.vmem [shape: f32[512,1], index: 3, kind: output, shape index: {}]  }
   0x1 LB: > { %s1075_s13 = sadd.s32 4294967295, %s1103_s12   ;;  %p1079_p0 = scmp.ge.s32.totalorder %s1103_s12, 1  ;;  %s1103_s12 = sphi %s1126_s12, %s13_s12  }
   0x2   : > { %p138_p1 = scmp.lt.s32.totalorder %s1103_s12, 3 }
   0x4   : > { %p139_p2 = pnand %p1079_p0, %p138_p1 }
   0x5   : > { %s1080_s14 = sshll.u32 (!%p139_p2), %s1075_s13, 5 }
   0x6   : > { %142 = sbr.rel (%p139_p2) target bundleno = 370 (0x172), region = 32  ;;  %p163_p3 = scmp.lt.s32.totalorder (!%p139_p2), %s1080_s14, 63 }
   0xb   : > { %v1105_v0 = vmov 0   ;;  %s1878_s14 = smov (!%p163_p3, %s1080_s14), 63  ;;  %v401_v33 = vlaneseq  ;;  %v238_v37 = vld [vmem:[%s1874_s1] sm:$0xf] }
   0xc   : > { %1096 = vset.pattern.permute.xlu1 %v1105_v0  ;;  %1095 = vset.pattern.permute.xlu0 %v1105_v0  ;;  %s1081_s15 = sshll.u32 %s1878_s14, 3  ;;  %v239_v40 = vld [vmem:[%s1875_s2] sm:$0xf] }
   0xd   : > { %s1142_s18 = scalar_lea.vmem %s1873_s0, %s1081_s15  ;;  %v402_v34 = vshrl.u32 %v401_v33, 7  ;;  %s1804_s25 = scalar_lea.vmem %s1876_s3, %s1081_s15 }
   0xe   : > { %v176_v1 = vld [vmem:[%s1142_s18 + $0x10] sm:$0xff]  ;;  %v174_v2 = vld [vmem:[%s1142_s18] sm:$0xff]  ;;  %v177_v3 = vld [vmem:[%s1142_s18 + $0x18] sm:$0xff] }
   0xf   : > { %252 = vperm.xlu1 %1096, %v176_v1   ;;  %242 = vperm.xlu0 %1095, %v174_v2   ;;  %v175_v4 = vld [vmem:[%s1142_s18 + $0x8] sm:$0xff]  ;;  %v178_v6 = vld [vmem:[%s1142_s18 + $0x20] sm:$0xff]  ;;  %v181_v7 = vld [vmem:[%s1142_s18 + $0x38] sm:$0xff]  ;;  %v403_v35 = vsub.s32 0, %v402_v34  ;;  %v407_v36 = vsub.s32 1, %v402_v34  ;;  %v411_v38 = vsub.s32 2, %v402_v34 }
  0x10   : > { %v179_v5 = vld [vmem:[%s1142_s18 + $0x28] sm:$0xff]  ;;  %v180_v8 = vld [vmem:[%s1142_s18 + $0x30] sm:$0xff]  ;;  %v182_v10 = vld [vmem:[%s1142_s18 + $0x40] sm:$0xff]  ;;  %v415_v39 = vsub.s32 3, %v402_v34 }
  0x11   : > { %v183_v9 = vld [vmem:[%s1142_s18 + $0x48] sm:$0xff]  ;;  %v185_v11 = vld [vmem:[%s1142_s18 + $0x58] sm:$0xff]  ;;  %v184_v12 = vld [vmem:[%s1142_s18 + $0x50] sm:$0xff]  ;;  %v1182_v41 = vrot.slane %v238_v37, %v403_v35  ;;  %v1184_v42 = vrot.slane %v238_v37, %v407_v36  ;;  %v1186_v43 = vrot.slane %v238_v37, %v411_v38  ;;  %v1190_v45 = vrot.slane %v239_v40, %v403_v35 }
  0x12   : > { %v187_v13 = vld [vmem:[%s1142_s18 + $0x68] sm:$0xff]  ;;  %v186_v14 = vld [vmem:[%s1142_s18 + $0x60] sm:$0xff]  ;;  %v189_v15 = vld [vmem:[%s1142_s18 + $0x78] sm:$0xff]  ;;  %v1188_v44 = vrot.slane %v238_v37, %v415_v39  ;;  %v1192_v46 = vrot.slane %v239_v40, %v407_v36  ;;  %v1194_v49 = vrot.slane %v239_v40, %v411_v38  ;;  %v1196_v50 = vrot.slane %v239_v40, %v415_v39 }
  0x13   : > { %257 = vperm.xlu1 %1096, %v177_v3   ;;  %247 = vperm.xlu0 %1095, %v175_v4   ;;  %v188_v16 = vld [vmem:[%s1142_s18 + $0x70] sm:$0xff]  ;;  %v191_v17 = vld [vmem:[%s1142_s18 + $0x88] sm:$0xff]  ;;  %v190_v18 = vld [vmem:[%s1142_s18 + $0x80] sm:$0xff] }
  0x14   : > { %v193_v19 = vld [vmem:[%s1142_s18 + $0x98] sm:$0xff]  ;;  %v192_v20 = vld [vmem:[%s1142_s18 + $0x90] sm:$0xff]  ;;  %v195_v21 = vld [vmem:[%s1142_s18 + $0xa8] sm:$0xff] }
  0x15   : > { %v194_v22 = vld [vmem:[%s1142_s18 + $0xa0] sm:$0xff]  ;;  %v197_v23 = vld [vmem:[%s1142_s18 + $0xb8] sm:$0xff]  ;;  %v196_v24 = vld [vmem:[%s1142_s18 + $0xb0] sm:$0xff] }
  0x16   : > { %v199_v25 = vld [vmem:[%s1142_s18 + $0xc8] sm:$0xff]  ;;  %v198_v26 = vld [vmem:[%s1142_s18 + $0xc0] sm:$0xff]  ;;  %v201_v27 = vld [vmem:[%s1142_s18 + $0xd8] sm:$0xff] }
  0x17   : > { %267 = vperm.xlu1 %1096, %v179_v5   ;;  %262 = vperm.xlu0 %1095, %v178_v6   ;;  %v200_v28 = vld [vmem:[%s1142_s18 + $0xd0] sm:$0xff]  ;;  %v203_v29 = vld [vmem:[%s1142_s18 + $0xe8] sm:$0xff]  ;;  %v202_v30 = vld [vmem:[%s1142_s18 + $0xe0] sm:$0xff] }
  0x18   : > { %v205_v31 = vld [vmem:[%s1142_s18 + $0xf8] sm:$0xff]  ;;  %v204_v32 = vld [vmem:[%s1142_s18 + $0xf0] sm:$0xff] }
  0x1b   : > { %277 = vperm.xlu1 %1096, %v181_v7   ;;  %272 = vperm.xlu0 %1095, %v180_v8  }
  0x1f   : > { %287 = vperm.xlu1 %1096, %v183_v9   ;;  %282 = vperm.xlu0 %1095, %v182_v10  }
  0x23   : > { %297 = vperm.xlu1 %1096, %v185_v11   ;;  %292 = vperm.xlu0 %1095, %v184_v12  }
  0x27   : > { %307 = vperm.xlu1 %1096, %v187_v13   ;;  %302 = vperm.xlu0 %1095, %v186_v14  }
  0x2b   : > { %317 = vperm.xlu1 %1096, %v189_v15   ;;  %312 = vperm.xlu0 %1095, %v188_v16  }
  0x2f   : > { %327 = vperm.xlu1 %1096, %v191_v17   ;;  %322 = vperm.xlu0 %1095, %v190_v18  }
  0x33   : > { %337 = vperm.xlu1 %1096, %v193_v19   ;;  %332 = vperm.xlu0 %1095, %v192_v20  }
  0x37   : > { %347 = vperm.xlu1 %1096, %v195_v21   ;;  %342 = vperm.xlu0 %1095, %v194_v22  }
  0x3b   : > { %357 = vperm.xlu1 %1096, %v197_v23   ;;  %352 = vperm.xlu0 %1095, %v196_v24  }
  0x3f   : > { %367 = vperm.xlu1 %1096, %v199_v25   ;;  %362 = vperm.xlu0 %1095, %v198_v26  }
  0x43   : > { %377 = vperm.xlu1 %1096, %v201_v27   ;;  %372 = vperm.xlu0 %1095, %v200_v28  }
  0x47   : > { %387 = vperm.xlu1 %1096, %v203_v29   ;;  %382 = vperm.xlu0 %1095, %v202_v30  }
  0x4b   : > { %397 = vperm.xlu1 %1096, %v205_v31   ;;  %392 = vperm.xlu0 %1095, %v204_v32  }
  0x8a   : > { %v253_v47 = vpop.permute.xlu1 %252  ;;  %v243_v48 = vpop.permute.xlu0 %242 }
  0x8b   : > { %vm429_vm0 = vcmp.lt.f32.partialorder %v253_v47, %v1182_v41  ;;  %vm430_vm1 = vcmp.lt.f32.partialorder %v253_v47, %v1184_v42  ;;  %vm421_vm2 = vcmp.lt.f32.partialorder %v243_v48, %v1182_v41  ;;  %vm422_vm3 = vcmp.lt.f32.partialorder %v243_v48, %v1184_v42 }
  0x8c   : > { %vm423_vm4 = vcmp.lt.f32.partialorder %v243_v48, %v1186_v43  ;;  %vm424_vm5 = vcmp.lt.f32.partialorder %v243_v48, %v1188_v44  ;;  %v570_v51 = vsel %vm421_vm2, %v1190_v45, 0.0  ;;  %v571_v52 = vsel %vm422_vm3, %v1192_v46, 0.0 }
  0x8d   : > { %v698_v53 = vadd.f32 %v571_v52, %v570_v51  ;;  %vm431_vm6 = vcmp.lt.f32.partialorder %v253_v47, %v1186_v43  ;;  %v572_v56 = vsel %vm423_vm4, %v1194_v49, 0.0  ;;  %v578_v57 = vsel %vm429_vm0, %v1190_v45, 0.0 }
  0x8e   : > { %v258_v54 = vpop.permute.xlu1 %257  ;;  %v248_v55 = vpop.permute.xlu0 %247  ;;  %v579_v58 = vsel %vm430_vm1, %v1192_v46, 0.0  ;;  %v573_v59 = vsel %vm424_vm5, %v1196_v50, 0.0  ;;  %v580_v60 = vsel %vm431_vm6, %v1194_v49, 0.0  ;;  %vm432_vm9 = vcmp.lt.f32.partialorder %v253_v47, %v1188_v44 }
  0x8f   : > { %vm425_vm7 = vcmp.lt.f32.partialorder %v248_v55, %v1182_v41  ;;  %vm426_vm8 = vcmp.lt.f32.partialorder %v248_v55, %v1184_v42  ;;  %v730_v61 = vadd.f32 %v698_v53, %v572_v56  ;;  %v700_v62 = vadd.f32 %v579_v58, %v578_v57 }
  0x90   : > { %vm427_vm10 = vcmp.lt.f32.partialorder %v248_v55, %v1186_v43  ;;  %vm433_vm11 = vcmp.lt.f32.partialorder %v258_v54, %v1182_v41  ;;  %vm428_vm12 = vcmp.lt.f32.partialorder %v248_v55, %v1188_v44  ;;  %v574_v63 = vsel %vm425_vm7, %v1190_v45, 0.0 }
  0x91   : > { %v575_v0 = vsel %vm426_vm8, %v1192_v46, 0.0  ;;  %vm434_vm13 = vcmp.lt.f32.partialorder %v258_v54, %v1184_v42  ;;  %v762_v3 = vadd.f32 %v730_v61, %v573_v59  ;;  %v732_v4 = vadd.f32 %v700_v62, %v580_v60 }
  0x92   : > { %v268_v1 = vpop.permute.xlu1 %267  ;;  %v263_v2 = vpop.permute.xlu0 %262  ;;  %v699_v5 = vadd.f32 %v575_v0, %v574_v63  ;;  %v581_v6 = vsel %vm432_vm9, %v1196_v50, 0.0  ;;  %v576_v7 = vsel %vm427_vm10, %v1194_v49, 0.0  ;;  %v577_v8 = vsel %vm428_vm12, %v1196_v50, 0.0 }
  0x93   : > { %922 = vadd.xlane.f32.xlu0 %v762_v3  ;;  %vm435_vm14 = vcmp.lt.f32.partialorder %v258_v54, %v1186_v43  ;;  %vm436_vm15 = vcmp.lt.f32.partialorder %v258_v54, %v1188_v44  ;;  %vm437_vm0 = vcmp.lt.f32.partialorder %v263_v2, %v1182_v41  ;;  %vm438_vm1 = vcmp.lt.f32.partialorder %v263_v2, %v1184_v42 }
  0x94   : > { %v731_v9 = vadd.f32 %v699_v5, %v576_v7  ;;  %v582_v10 = vsel %vm433_vm11, %v1190_v45, 0.0  ;;  %v583_v11 = vsel %vm434_vm13, %v1192_v46, 0.0  ;;  %v764_v14 = vadd.f32 %v732_v4, %v581_v6 }
  0x95   : > { %v701_v16 = vadd.f32 %v583_v11, %v582_v10  ;;  %vm441_vm2 = vcmp.lt.f32.partialorder %v268_v1, %v1182_v41  ;;  %vm442_vm3 = vcmp.lt.f32.partialorder %v268_v1, %v1184_v42  ;;  %v584_v17 = vsel %vm435_vm14, %v1194_v49, 0.0 }
  0x96   : > { %v1234_v12 = vpop.permute.xlu1 %277  ;;  %v273_v13 = vpop.permute.xlu0 %272  ;;  %v763_v15 = vadd.f32 %v731_v9, %v577_v8  ;;  %v585_v18 = vsel %vm436_vm15, %v1196_v50, 0.0  ;;  %vm439_vm4 = vcmp.lt.f32.partialorder %v263_v2, %v1186_v43  ;;  %v586_v20 = vsel %vm437_vm0, %v1190_v45, 0.0 }
  0x97   : > { %926 = vadd.xlane.f32.xlu0 %v764_v14  ;;  %v733_v19 = vadd.f32 %v701_v16, %v584_v17  ;;  %v587_v21 = vsel %vm438_vm1, %v1192_v46, 0.0  ;;  %vm445_vm5 = vcmp.lt.f32.partialorder %v273_v13, %v1182_v41  ;;  %vm446_vm6 = vcmp.lt.f32.partialorder %v273_v13, %v1184_v42 }
  0x98   : > { %924 = vadd.xlane.f32.xlu1 %v763_v15  ;;  %vm440_vm7 = vcmp.lt.f32.partialorder %v263_v2, %v1188_v44  ;;  %v702_v22 = vadd.f32 %v587_v21, %v586_v20  ;;  %vm443_vm8 = vcmp.lt.f32.partialorder %v268_v1, %v1186_v43  ;;  %v590_v26 = vsel %vm441_vm2, %v1190_v45, 0.0 }
  0x99   : > { %v765_v25 = vadd.f32 %v733_v19, %v585_v18  ;;  %v591_v27 = vsel %vm442_vm3, %v1192_v46, 0.0  ;;  %vm449_vm9 = vcmp.lt.f32.partialorder %v1234_v12, %v1182_v41  ;;  %vm450_vm10 = vcmp.lt.f32.partialorder %v1234_v12, %v1184_v42 }
  0x9a   : > { %v1250_v23 = vpop.permute.xlu1 %287  ;;  %v1252_v24 = vpop.permute.xlu0 %282  ;;  %v588_v28 = vsel %vm439_vm4, %v1194_v49, 0.0  ;;  %vm444_vm11 = vcmp.lt.f32.partialorder %v268_v1, %v1188_v44  ;;  %v703_v30 = vadd.f32 %v591_v27, %v590_v26  ;;  %vm447_vm12 = vcmp.lt.f32.partialorder %v273_v13, %v1186_v43 }
  0x9b   : > { %928 = vadd.xlane.f32.xlu0 %v765_v25  ;;  %v734_v29 = vadd.f32 %v702_v22, %v588_v28  ;;  %v589_v31 = vsel %vm440_vm7, %v1196_v50, 0.0  ;;  %v592_v32 = vsel %vm443_vm8, %v1194_v49, 0.0  ;;  %v594_v33 = vsel %vm445_vm5, %v1190_v45, 0.0 }
  0x9c   : > { %v595_v34 = vsel %vm446_vm6, %v1192_v46, 0.0  ;;  %v735_v38 = vadd.f32 %v703_v30, %v592_v32  ;;  %vm448_vm13 = vcmp.lt.f32.partialorder %v273_v13, %v1188_v44  ;;  %v593_v40 = vsel %vm444_vm11, %v1196_v50, 0.0 }
  0x9d   : > { %v766_v35 = vadd.f32 %v734_v29, %v589_v31  ;;  %v704_v39 = vadd.f32 %v595_v34, %v594_v33  ;;  %v596_v47 = vsel %vm447_vm12, %v1194_v49, 0.0  ;;  %vm453_vm14 = vcmp.lt.f32.partialorder %v1252_v24, %v1182_v41 }
  0x9e   : > { %v1278_v36 = vpop.permute.xlu1 %297  ;;  %v1280_v37 = vpop.permute.xlu0 %292  ;;  %v767_v48 = vadd.f32 %v735_v38, %v593_v40  ;;  %vm451_vm15 = vcmp.lt.f32.partialorder %v1234_v12, %v1186_v43  ;;  %vm454_vm0 = vcmp.lt.f32.partialorder %v1252_v24, %v1184_v42  ;;  %v597_v52 = vsel %vm448_vm13, %v1196_v50, 0.0 }
  0x9f   : > { %930 = vadd.xlane.f32.xlu1 %v766_v35  ;;  %v736_v51 = vadd.f32 %v704_v39, %v596_v47  ;;  %v598_v53 = vsel %vm449_vm9, %v1190_v45, 0.0  ;;  %v599_v54 = vsel %vm450_vm10, %v1192_v46, 0.0  ;;  %vm452_vm1 = vcmp.lt.f32.partialorder %v1234_v12, %v1188_v44 }
  0xa0   : > { %932 = vadd.xlane.f32.xlu0 %v767_v48  ;;  %v705_v58 = vadd.f32 %v599_v54, %v598_v53  ;;  %vm455_vm2 = vcmp.lt.f32.partialorder %v1252_v24, %v1186_v43  ;;  %vm457_vm3 = vcmp.lt.f32.partialorder %v1250_v23, %v1182_v41  ;;  %vm458_vm4 = vcmp.lt.f32.partialorder %v1250_v23, %v1184_v42 }
  0xa1   : > { %v768_v55 = vadd.f32 %v736_v51, %v597_v52  ;;  %vm461_vm5 = vcmp.lt.f32.partialorder %v1280_v37, %v1182_v41  ;;  %v600_v59 = vsel %vm451_vm15, %v1194_v49, 0.0  ;;  %vm462_vm6 = vcmp.lt.f32.partialorder %v1280_v37, %v1184_v42 }
  0xa2   : > { %v1300_v56 = vpop.permute.xlu1 %307  ;;  %v1302_v57 = vpop.permute.xlu0 %302  ;;  %v737_v60 = vadd.f32 %v705_v58, %v600_v59  ;;  %v602_v61 = vsel %vm453_vm14, %v1190_v45, 0.0  ;;  %v603_v62 = vsel %vm454_vm0, %v1192_v46, 0.0  ;;  %v601_v63 = vsel %vm452_vm1, %v1196_v50, 0.0 }
  0xa3   : > { %934 = vadd.xlane.f32.xlu1 %v768_v55  ;;  %vm456_vm7 = vcmp.lt.f32.partialorder %v1252_v24, %v1188_v44  ;;  %v604_v0 = vsel %vm455_vm2, %v1194_v49, 0.0  ;;  %v706_v1 = vadd.f32 %v603_v62, %v602_v61  ;;  %vm459_vm8 = vcmp.lt.f32.partialorder %v1250_v23, %v1186_v43 }
  0xa4   : > { %v769_v2 = vadd.f32 %v737_v60, %v601_v63  ;;  %v606_v5 = vsel %vm457_vm3, %v1190_v45, 0.0  ;;  %v607_v6 = vsel %vm458_vm4, %v1192_v46, 0.0  ;;  %vm465_vm9 = vcmp.lt.f32.partialorder %v1278_v36, %v1182_v41 }
  0xa5   : > { %vm466_vm10 = vcmp.lt.f32.partialorder %v1278_v36, %v1184_v42  ;;  %v738_v7 = vadd.f32 %v706_v1, %v604_v0  ;;  %v605_v8 = vsel %vm456_vm7, %v1196_v50, 0.0  ;;  %vm460_vm11 = vcmp.lt.f32.partialorder %v1250_v23, %v1188_v44 }
  0xa6   : > { %v1329_v3 = vpop.permute.xlu1 %317  ;;  %v1331_v4 = vpop.permute.xlu0 %312  ;;  %936 = vadd.xlane.f32.xlu0 %v769_v2  ;;  %v707_v9 = vadd.f32 %v607_v6, %v606_v5  ;;  %vm463_vm12 = vcmp.lt.f32.partialorder %v1280_v37, %v1186_v43  ;;  %v608_v11 = vsel %vm459_vm8, %v1194_v49, 0.0  ;;  %v610_v12 = vsel %vm461_vm5, %v1190_v45, 0.0 }
  0xa7   : > { %v770_v10 = vadd.f32 %v738_v7, %v605_v8  ;;  %v611_v13 = vsel %vm462_vm6, %v1192_v46, 0.0  ;;  %vm473_vm13 = vcmp.lt.f32.partialorder %v1300_v56, %v1182_v41  ;;  %vm464_vm14 = vcmp.lt.f32.partialorder %v1280_v37, %v1188_v44 }
  0xa8   : > { %v739_v14 = vadd.f32 %v707_v9, %v608_v11  ;;  %v708_v15 = vadd.f32 %v611_v13, %v610_v12  ;;  %vm474_vm15 = vcmp.lt.f32.partialorder %v1300_v56, %v1184_v42  ;;  %vm469_vm0 = vcmp.lt.f32.partialorder %v1302_v57, %v1182_v41 }
  0xa9   : > { %938 = vadd.xlane.f32.xlu1 %v770_v10  ;;  %v609_v18 = vsel %vm460_vm11, %v1196_v50, 0.0  ;;  %v612_v19 = vsel %vm463_vm12, %v1194_v49, 0.0  ;;  %vm470_vm1 = vcmp.lt.f32.partialorder %v1302_v57, %v1184_v42  ;;  %vm467_vm2 = vcmp.lt.f32.partialorder %v1278_v36, %v1186_v43 }
  0xaa   : > { %v1365_v16 = vpop.permute.xlu1 %327  ;;  %v1367_v17 = vpop.permute.xlu0 %322  ;;  %v771_v20 = vadd.f32 %v739_v14, %v609_v18  ;;  %v740_v21 = vadd.f32 %v708_v15, %v612_v19  ;;  %vm481_vm3 = vcmp.lt.f32.partialorder %v1329_v3, %v1182_v41  ;;  %v613_v22 = vsel %vm464_vm14, %v1196_v50, 0.0 }
  0xab   : > { %v614_v23 = vsel %vm465_vm9, %v1190_v45, 0.0  ;;  %v615_v24 = vsel %vm466_vm10, %v1192_v46, 0.0  ;;  %vm468_vm4 = vcmp.lt.f32.partialorder %v1278_v36, %v1188_v44  ;;  %vm471_vm5 = vcmp.lt.f32.partialorder %v1302_v57, %v1186_v43 }
  0xac   : > { %940 = vadd.xlane.f32.xlu0 %v771_v20  ;;  %v772_v25 = vadd.f32 %v740_v21, %v613_v22  ;;  %v709_v26 = vadd.f32 %v615_v24, %v614_v23  ;;  %vm482_vm6 = vcmp.lt.f32.partialorder %v1329_v3, %v1184_v42  ;;  %v616_v29 = vsel %vm467_vm2, %v1194_v49, 0.0 }
  0xad   : > { %v618_v30 = vsel %vm469_vm0, %v1190_v45, 0.0  ;;  %v619_v31 = vsel %vm470_vm1, %v1192_v46, 0.0  ;;  %vm477_vm7 = vcmp.lt.f32.partialorder %v1331_v4, %v1182_v41  ;;  %vm472_vm8 = vcmp.lt.f32.partialorder %v1302_v57, %v1188_v44 }
  0xae   : > { %v1397_v27 = vpop.permute.xlu1 %337  ;;  %v1399_v28 = vpop.permute.xlu0 %332  ;;  %942 = vadd.xlane.f32.xlu1 %v772_v25  ;;  %v741_v32 = vadd.f32 %v709_v26, %v616_v29  ;;  %v710_v33 = vadd.f32 %v619_v31, %v618_v30  ;;  %vm478_vm9 = vcmp.lt.f32.partialorder %v1331_v4, %v1184_v42  ;;  %v617_v34 = vsel %vm468_vm4, %v1196_v50, 0.0 }
  0xaf   : > { %v620_v35 = vsel %vm471_vm5, %v1194_v49, 0.0  ;;  %vm475_vm10 = vcmp.lt.f32.partialorder %v1300_v56, %v1186_v43  ;;  %v622_v38 = vsel %vm473_vm13, %v1190_v45, 0.0  ;;  %v623_v39 = vsel %vm474_vm15, %v1192_v46, 0.0 }
  0xb0   : > { %v773_v36 = vadd.f32 %v741_v32, %v617_v34  ;;  %v742_v37 = vadd.f32 %v710_v33, %v620_v35  ;;  %v621_v40 = vsel %vm472_vm8, %v1196_v50, 0.0  ;;  %vm476_vm11 = vcmp.lt.f32.partialorder %v1300_v56, %v1188_v44 }
  0xb1   : > { %v711_v47 = vadd.f32 %v623_v39, %v622_v38  ;;  %vm479_vm12 = vcmp.lt.f32.partialorder %v1331_v4, %v1186_v43  ;;  %v624_v52 = vsel %vm475_vm10, %v1194_v49, 0.0  ;;  %v626_v53 = vsel %vm477_vm7, %v1190_v45, 0.0 }
  0xb2   : > { %v1435_v48 = vpop.permute.xlu0 %342  ;;  %944 = vadd.xlane.f32.xlu0 %v773_v36  ;;  %v774_v51 = vadd.f32 %v742_v37, %v621_v40  ;;  %v627_v54 = vsel %vm478_vm9, %v1192_v46, 0.0  ;;  %v1446_v55 = vpop.permute.xlu1 %347  ;;  %vm489_vm13 = vcmp.lt.f32.partialorder %v1365_v16, %v1182_v41  ;;  %vm480_vm14 = vcmp.lt.f32.partialorder %v1331_v4, %v1188_v44 }
  0xb3   : > { %v743_v57 = vadd.f32 %v711_v47, %v624_v52  ;;  %v712_v58 = vadd.f32 %v627_v54, %v626_v53  ;;  %vm490_vm15 = vcmp.lt.f32.partialorder %v1365_v16, %v1184_v42  ;;  %vm485_vm0 = vcmp.lt.f32.partialorder %v1367_v17, %v1182_v41 }
  0xb4   : > { %946 = vadd.xlane.f32.xlu1 %v774_v51  ;;  %v625_v59 = vsel %vm476_vm11, %v1196_v50, 0.0  ;;  %v628_v60 = vsel %vm479_vm12, %v1194_v49, 0.0  ;;  %vm486_vm1 = vcmp.lt.f32.partialorder %v1367_v17, %v1184_v42  ;;  %vm483_vm2 = vcmp.lt.f32.partialorder %v1329_v3, %v1186_v43 }
  0xb5   : > { %v775_v61 = vadd.f32 %v743_v57, %v625_v59  ;;  %v744_v62 = vadd.f32 %v712_v58, %v628_v60  ;;  %vm497_vm4 = vcmp.lt.f32.partialorder %v1397_v27, %v1182_v41  ;;  %v629_v63 = vsel %vm480_vm14, %v1196_v50, 0.0 }
  0xb6   : > { %v630_v56 = vsel %vm481_vm3, %v1190_v45, 0.0  ;;  %v631_v0 = vsel %vm482_vm6, %v1192_v46, 0.0  ;;  %vm484_vm5 = vcmp.lt.f32.partialorder %v1329_v3, %v1188_v44  ;;  %vm487_vm7 = vcmp.lt.f32.partialorder %v1367_v17, %v1186_v43  ;;  %v1483_v4 = vpop.permute.xlu0 %352  ;;  %v1496_v7 = vpop.permute.xlu1 %357 }
  0xb7   : > { %948 = vadd.xlane.f32.xlu0 %v775_v61  ;;  %v776_v1 = vadd.f32 %v744_v62, %v629_v63  ;;  %v713_v2 = vadd.f32 %v631_v0, %v630_v56  ;;  %vm498_vm8 = vcmp.lt.f32.partialorder %v1397_v27, %v1184_v42  ;;  %v632_v5 = vsel %vm483_vm2, %v1194_v49, 0.0 }
  0xb8   : > { %v634_v6 = vsel %vm485_vm0, %v1190_v45, 0.0  ;;  %v635_v3 = vsel %vm486_vm1, %v1192_v46, 0.0  ;;  %vm493_vm3 = vcmp.lt.f32.partialorder %v1399_v28, %v1182_v41  ;;  %vm488_vm6 = vcmp.lt.f32.partialorder %v1367_v17, %v1188_v44 }
  0xb9   : > { %950 = vadd.xlane.f32.xlu1 %v776_v1  ;;  %v745_v8 = vadd.f32 %v713_v2, %v632_v5  ;;  %v714_v9 = vadd.f32 %v635_v3, %v634_v6  ;;  %vm494_vm9 = vcmp.lt.f32.partialorder %v1399_v28, %v1184_v42  ;;  %v633_v10 = vsel %vm484_vm5, %v1196_v50, 0.0 }
  0xba   : > { %v636_v11 = vsel %vm487_vm7, %v1194_v49, 0.0  ;;  %vm491_vm10 = vcmp.lt.f32.partialorder %v1365_v16, %v1186_v43  ;;  %v638_v14 = vsel %vm489_vm13, %v1190_v45, 0.0  ;;  %v639_v15 = vsel %vm490_vm15, %v1192_v46, 0.0  ;;  %v1530_v23 = vpop.permute.xlu0 %362  ;;  %v1536_v26 = vpop.permute.xlu1 %367 }
  0xbb   : > { %v777_v12 = vadd.f32 %v745_v8, %v633_v10  ;;  %v746_v13 = vadd.f32 %v714_v9, %v636_v11  ;;  %v637_v17 = vsel %vm488_vm6, %v1196_v50, 0.0  ;;  %vm492_vm11 = vcmp.lt.f32.partialorder %v1365_v16, %v1188_v44 }
  0xbc   : > { %v715_v18 = vadd.f32 %v639_v15, %v638_v14  ;;  %vm495_vm12 = vcmp.lt.f32.partialorder %v1399_v28, %v1186_v43  ;;  %v640_v20 = vsel %vm491_vm10, %v1194_v49, 0.0  ;;  %v642_v21 = vsel %vm493_vm3, %v1190_v45, 0.0 }
  0xbd   : > { %952 = vadd.xlane.f32.xlu0 %v777_v12  ;;  %v778_v19 = vadd.f32 %v746_v13, %v637_v17  ;;  %v643_v22 = vsel %vm494_vm9, %v1192_v46, 0.0  ;;  %vm505_vm13 = vcmp.lt.f32.partialorder %v1446_v55, %v1182_v41  ;;  %vm496_vm14 = vcmp.lt.f32.partialorder %v1399_v28, %v1188_v44 }
  0xbe   : > { %v747_v24 = vadd.f32 %v715_v18, %v640_v20  ;;  %v716_v25 = vadd.f32 %v643_v22, %v642_v21  ;;  %vm506_vm15 = vcmp.lt.f32.partialorder %v1446_v55, %v1184_v42  ;;  %vm501_vm0 = vcmp.lt.f32.partialorder %v1435_v48, %v1182_v41  ;;  %v1588_v47 = vpop.permute.xlu1 %377 }
  0xbf   : > { %954 = vadd.xlane.f32.xlu1 %v778_v19  ;;  %v641_v29 = vsel %vm492_vm11, %v1196_v50, 0.0  ;;  %v644_v30 = vsel %vm495_vm12, %v1194_v49, 0.0  ;;  %vm502_vm1 = vcmp.lt.f32.partialorder %v1435_v48, %v1184_v42  ;;  %vm499_vm2 = vcmp.lt.f32.partialorder %v1397_v27, %v1186_v43 }
  0xc0   : > { %v779_v31 = vadd.f32 %v747_v24, %v641_v29  ;;  %v748_v32 = vadd.f32 %v716_v25, %v644_v30  ;;  %vm513_vm5 = vcmp.lt.f32.partialorder %v1496_v7, %v1182_v41  ;;  %vm514_vm7 = vcmp.lt.f32.partialorder %v1496_v7, %v1184_v42 }
  0xc1   : > { %v645_v16 = vsel %vm496_vm14, %v1196_v50, 0.0  ;;  %v646_v28 = vsel %vm497_vm4, %v1190_v45, 0.0  ;;  %v647_v33 = vsel %vm498_vm8, %v1192_v46, 0.0  ;;  %vm500_vm3 = vcmp.lt.f32.partialorder %v1397_v27, %v1188_v44  ;;  %v1582_v27 = vpop.permute.xlu0 %372 }
  0xc2   : > { %956 = vadd.xlane.f32.xlu0 %v779_v31  ;;  %v780_v34 = vadd.f32 %v748_v32, %v645_v16  ;;  %v717_v35 = vadd.f32 %v647_v33, %v646_v28  ;;  %vm503_vm6 = vcmp.lt.f32.partialorder %v1435_v48, %v1186_v43  ;;  %vm509_vm9 = vcmp.lt.f32.partialorder %v1483_v4, %v1182_v41  ;;  %v1642_v6 = vpop.permute.xlu1 %387 }
  0xc3   : > { %v648_v36 = vsel %vm499_vm2, %v1194_v49, 0.0  ;;  %v650_v37 = vsel %vm501_vm0, %v1190_v45, 0.0  ;;  %v651_v38 = vsel %vm502_vm1, %v1192_v46, 0.0  ;;  %vm510_vm4 = vcmp.lt.f32.partialorder %v1483_v4, %v1184_v42 }
  0xc4   : > { %958 = vadd.xlane.f32.xlu1 %v780_v34  ;;  %v749_v39 = vadd.f32 %v717_v35, %v648_v36  ;;  %vm504_vm8 = vcmp.lt.f32.partialorder %v1435_v48, %v1188_v44  ;;  %v718_v40 = vadd.f32 %v651_v38, %v650_v37  ;;  %vm517_vm10 = vcmp.lt.f32.partialorder %v1530_v23, %v1182_v41 }
  0xc5   : > { %v649_v51 = vsel %vm500_vm3, %v1196_v50, 0.0  ;;  %v652_v52 = vsel %vm503_vm6, %v1194_v49, 0.0  ;;  %vm507_vm11 = vcmp.lt.f32.partialorder %v1446_v55, %v1186_v43  ;;  %vm521_vm12 = vcmp.lt.f32.partialorder %v1536_v26, %v1182_v41  ;;  %v1626_v1 = vpop.permute.xlu0 %382 }
  0xc6   : > { %vm522_vm14 = vcmp.lt.f32.partialorder %v1536_v26, %v1184_v42  ;;  %v781_v48 = vadd.f32 %v749_v39, %v649_v51  ;;  %v750_v53 = vadd.f32 %v718_v40, %v652_v52  ;;  %v654_v54 = vsel %vm505_vm13, %v1190_v45, 0.0  ;;  %v1688_v22 = vpop.permute.xlu1 %397 }
  0xc7   : > { %v655_v57 = vsel %vm506_vm15, %v1192_v46, 0.0  ;;  %v653_v58 = vsel %vm504_vm8, %v1196_v50, 0.0  ;;  %vm508_vm0 = vcmp.lt.f32.partialorder %v1446_v55, %v1188_v44  ;;  %vm511_vm1 = vcmp.lt.f32.partialorder %v1483_v4, %v1186_v43 }
  0xc8   : > { %v719_v59 = vadd.f32 %v655_v57, %v654_v54  ;;  %960 = vadd.xlane.f32.xlu0 %v781_v48  ;;  %v782_v60 = vadd.f32 %v750_v53, %v653_v58  ;;  %v656_v61 = vsel %vm507_vm11, %v1194_v49, 0.0  ;;  %v658_v62 = vsel %vm509_vm9, %v1190_v45, 0.0 }
  0xc9   : > { %v659_v63 = vsel %vm510_vm4, %v1192_v46, 0.0  ;;  %vm518_vm13 = vcmp.lt.f32.partialorder %v1530_v23, %v1184_v42  ;;  %vm512_vm15 = vcmp.lt.f32.partialorder %v1483_v4, %v1188_v44  ;;  %vm529_vm2 = vcmp.lt.f32.partialorder %v1588_v47, %v1182_v41  ;;  %v1684_v19 = vpop.permute.xlu0 %392 }
  0xca   : > { %v751_v56 = vadd.f32 %v719_v59, %v656_v61  ;;  %v720_v0 = vadd.f32 %v659_v63, %v658_v62  ;;  %962 = vadd.xlane.f32.xlu1 %v782_v60  ;;  %vm530_vm3 = vcmp.lt.f32.partialorder %v1588_v47, %v1184_v42  ;;  %vm525_vm6 = vcmp.lt.f32.partialorder %v1582_v27, %v1182_v41 }
  0xcb   : > { %v657_v2 = vsel %vm508_vm0, %v1196_v50, 0.0  ;;  %v660_v5 = vsel %vm511_vm1, %v1194_v49, 0.0  ;;  %vm526_vm9 = vcmp.lt.f32.partialorder %v1582_v27, %v1184_v42  ;;  %vm515_vm4 = vcmp.lt.f32.partialorder %v1496_v7, %v1186_v43 }
  0xcc   : > { %v783_v3 = vadd.f32 %v751_v56, %v657_v2  ;;  %v752_v8 = vadd.f32 %v720_v0, %v660_v5  ;;  %v661_v9 = vsel %vm512_vm15, %v1196_v50, 0.0  ;;  %vm516_vm8 = vcmp.lt.f32.partialorder %v1496_v7, %v1188_v44 }
  0xcd   : > { %v662_v55 = vsel %vm513_vm5, %v1190_v45, 0.0  ;;  %v663_v4 = vsel %vm514_vm7, %v1192_v46, 0.0  ;;  %vm519_vm11 = vcmp.lt.f32.partialorder %v1530_v23, %v1186_v43  ;;  %vm520_vm0 = vcmp.lt.f32.partialorder %v1530_v23, %v1188_v44 }
  0xce   : > { %964 = vadd.xlane.f32.xlu0 %v783_v3  ;;  %v784_v10 = vadd.f32 %v752_v8, %v661_v9  ;;  %v721_v11 = vadd.f32 %v663_v4, %v662_v55  ;;  %vm533_vm1 = vcmp.lt.f32.partialorder %v1626_v1, %v1182_v41  ;;  %v664_v12 = vsel %vm515_vm4, %v1194_v49, 0.0 }
  0xcf   : > { %v666_v13 = vsel %vm517_vm10, %v1190_v45, 0.0  ;;  %v667_v14 = vsel %vm518_vm13, %v1192_v46, 0.0  ;;  %vm537_vm5 = vcmp.lt.f32.partialorder %v1642_v6, %v1182_v41  ;;  %vm538_vm7 = vcmp.lt.f32.partialorder %v1642_v6, %v1184_v42 }
  0xd0   : > { %966 = vadd.xlane.f32.xlu1 %v784_v10  ;;  %vm534_vm15 = vcmp.lt.f32.partialorder %v1626_v1, %v1184_v42  ;;  %v665_v15 = vsel %vm516_vm8, %v1196_v50, 0.0  ;;  %v753_v17 = vadd.f32 %v721_v11, %v664_v12  ;;  %v722_v18 = vadd.f32 %v667_v14, %v666_v13 }
  0xd1   : > { %v668_v20 = vsel %vm519_vm11, %v1194_v49, 0.0  ;;  %v669_v21 = vsel %vm520_vm0, %v1196_v50, 0.0  ;;  %vm523_vm10 = vcmp.lt.f32.partialorder %v1536_v26, %v1186_v43  ;;  %vm524_vm13 = vcmp.lt.f32.partialorder %v1536_v26, %v1188_v44 }
  0xd2   : > { %v785_v23 = vadd.f32 %v753_v17, %v665_v15  ;;  %v754_v24 = vadd.f32 %v722_v18, %v668_v20  ;;  %v670_v7 = vsel %vm521_vm12, %v1190_v45, 0.0  ;;  %v671_v25 = vsel %vm522_vm14, %v1192_v46, 0.0 }
  0xd3   : > { %vm541_vm4 = vcmp.lt.f32.partialorder %v1684_v19, %v1182_v41  ;;  %v672_v29 = vsel %vm523_vm10, %v1194_v49, 0.0  ;;  %v723_v30 = vadd.f32 %v671_v25, %v670_v7  ;;  %vm527_vm8 = vcmp.lt.f32.partialorder %v1582_v27, %v1186_v43 }
  0xd4   : > { %968 = vadd.xlane.f32.xlu0 %v785_v23  ;;  %v786_v31 = vadd.f32 %v754_v24, %v669_v21  ;;  %vm545_vm11 = vcmp.lt.f32.partialorder %v1688_v22, %v1182_v41  ;;  %vm546_vm12 = vcmp.lt.f32.partialorder %v1688_v22, %v1184_v42  ;;  %vm528_vm14 = vcmp.lt.f32.partialorder %v1582_v27, %v1188_v44 }
  0xd5   : > { %v674_v32 = vsel %vm525_vm6, %v1190_v45, 0.0  ;;  %v675_v16 = vsel %vm526_vm9, %v1192_v46, 0.0  ;;  %v673_v28 = vsel %vm524_vm13, %v1196_v50, 0.0  ;;  %v755_v33 = vadd.f32 %v723_v30, %v672_v29 }
  0xd6   : > { %v676_v34 = vsel %vm527_vm8, %v1194_v49, 0.0  ;;  %v724_v35 = vadd.f32 %v675_v16, %v674_v32  ;;  %970 = vadd.xlane.f32.xlu1 %v786_v31  ;;  %vm531_vm0 = vcmp.lt.f32.partialorder %v1588_v47, %v1186_v43  ;;  %vm532_vm6 = vcmp.lt.f32.partialorder %v1588_v47, %v1188_v44 }
  0xd7   : > { %v678_v36 = vsel %vm529_vm2, %v1190_v45, 0.0  ;;  %v679_v26 = vsel %vm530_vm3, %v1192_v46, 0.0  ;;  %vm542_vm9 = vcmp.lt.f32.partialorder %v1684_v19, %v1184_v42  ;;  %v787_v37 = vadd.f32 %v755_v33, %v673_v28 }
  0xd8   : > { %v677_v38 = vsel %vm528_vm14, %v1196_v50, 0.0  ;;  %v756_v27 = vadd.f32 %v724_v35, %v676_v34  ;;  %v725_v39 = vadd.f32 %v679_v26, %v678_v36  ;;  %vm535_vm10 = vcmp.lt.f32.partialorder %v1626_v1, %v1186_v43 }
  0xd9   : > { %vm536_vm13 = vcmp.lt.f32.partialorder %v1626_v1, %v1188_v44  ;;  %v682_v40 = vsel %vm533_vm1, %v1190_v45, 0.0  ;;  %972 = vadd.xlane.f32.xlu0 %v787_v37  ;;  %v680_v51 = vsel %vm531_vm0, %v1194_v49, 0.0  ;;  %v681_v52 = vsel %vm532_vm6, %v1196_v50, 0.0 }
  0xda   : > { %v788_v47 = vadd.f32 %v756_v27, %v677_v38  ;;  %v683_v48 = vsel %vm534_vm15, %v1192_v46, 0.0  ;;  %v757_v53 = vadd.f32 %v725_v39, %v680_v51  ;;  %vm539_vm2 = vcmp.lt.f32.partialorder %v1642_v6, %v1186_v43 }
  0xdb   : > { %v726_v54 = vadd.f32 %v683_v48, %v682_v40  ;;  %vm540_vm3 = vcmp.lt.f32.partialorder %v1642_v6, %v1188_v44  ;;  %v684_v57 = vsel %vm535_vm10, %v1194_v49, 0.0  ;;  %v685_v58 = vsel %vm536_vm13, %v1196_v50, 0.0 }
  0xdc   : > { %974 = vadd.xlane.f32.xlu1 %v788_v47  ;;  %v686_v59 = vsel %vm537_vm5, %v1190_v45, 0.0  ;;  %v687_v60 = vsel %vm538_vm7, %v1192_v46, 0.0  ;;  %v789_v61 = vadd.f32 %v757_v53, %v681_v52  ;;  %vm543_vm1 = vcmp.lt.f32.partialorder %v1684_v19, %v1186_v43 }
  0xdd   : > { %v758_v62 = vadd.f32 %v726_v54, %v684_v57  ;;  %v727_v63 = vadd.f32 %v687_v60, %v686_v59  ;;  %v688_v56 = vsel %vm539_vm2, %v1194_v49, 0.0  ;;  %v689_v0 = vsel %vm540_vm3, %v1196_v50, 0.0 }
  0xde   : > { %v690_v1 = vsel %vm541_vm4, %v1190_v45, 0.0  ;;  %v691_v2 = vsel %vm542_vm9, %v1192_v46, 0.0  ;;  %976 = vadd.xlane.f32.xlu0 %v789_v61  ;;  %vm544_vm5 = vcmp.lt.f32.partialorder %v1684_v19, %v1188_v44  ;;  %v692_v8 = vsel %vm543_vm1, %v1194_v49, 0.0 }
  0xdf   : > { %v790_v5 = vadd.f32 %v758_v62, %v685_v58  ;;  %v759_v6 = vadd.f32 %v727_v63, %v688_v56  ;;  %v728_v3 = vadd.f32 %v691_v2, %v690_v1  ;;  %vm547_vm7 = vcmp.lt.f32.partialorder %v1688_v22, %v1186_v43 }
  0xe0   : > { %v694_v9 = vsel %vm545_vm11, %v1190_v45, 0.0  ;;  %v695_v55 = vsel %vm546_vm12, %v1192_v46, 0.0  ;;  %v693_v11 = vsel %vm544_vm5, %v1196_v50, 0.0  ;;  %vm548_vm15 = vcmp.lt.f32.partialorder %v1688_v22, %v1188_v44 }
  0xe1   : > { %978 = vadd.xlane.f32.xlu1 %v790_v5  ;;  %v791_v4 = vadd.f32 %v759_v6, %v689_v0  ;;  %v760_v10 = vadd.f32 %v728_v3, %v692_v8  ;;  %v729_v43 = vadd.f32 %v695_v55, %v694_v9  ;;  %v696_v41 = vsel %vm547_vm7, %v1194_v49, 0.0 }
  0xe2   : > { %v697_v13 = vsel %vm548_vm15, %v1196_v50, 0.0  ;;  %vm986_vm4 = vcmask 7168  }
  0xe3   : > { %980 = vadd.xlane.f32.xlu0 %v791_v4  ;;  %v792_v12 = vadd.f32 %v760_v10, %v693_v11  ;;  %v761_v45 = vadd.f32 %v729_v43, %v696_v41 }
  0xe5   : > { %982 = vadd.xlane.f32.xlu1 %v792_v12  ;;  %v793_v42 = vadd.f32 %v761_v45, %v697_v13 }
  0xe7   : > { %984 = vadd.xlane.f32.xlu0 %v793_v42 }
 0x11c   : > { %v923_v44 = vpop.xlane.xlu0 %922 }
 0x11d   : > { %987 = vst.msk [vmem:[%s1804_s25] sm:$0xff] %vm986_vm4, %v923_v44 }
 0x120   : > { %v927_v49 = vpop.xlane.xlu0 %926 }
 0x121   : > { %v925_v46 = vpop.xlane.xlu1 %924  ;;  %989 = vst.msk [vmem:[%s1804_s25 + $0x10] sm:$0xff] %vm986_vm4, %v927_v49 }
 0x122   : > { %988 = vst.msk [vmem:[%s1804_s25 + $0x8] sm:$0xff] %vm986_vm4, %v925_v46 }
 0x124   : > { %v929_v50 = vpop.xlane.xlu0 %928 }
 0x125   : > { %990 = vst.msk [vmem:[%s1804_s25 + $0x18] sm:$0xff] %vm986_vm4, %v929_v50 }
 0x128   : > { %v931_v14 = vpop.xlane.xlu1 %930 }
 0x129   : > { %991 = vst.msk [vmem:[%s1804_s25 + $0x20] sm:$0xff] %vm986_vm4, %v931_v14  ;;  %v933_v15 = vpop.xlane.xlu0 %932 }
 0x12a   : > { %992 = vst.msk [vmem:[%s1804_s25 + $0x28] sm:$0xff] %vm986_vm4, %v933_v15 }
 0x12c   : > { %v935_v17 = vpop.xlane.xlu1 %934 }
 0x12d   : > { %993 = vst.msk [vmem:[%s1804_s25 + $0x30] sm:$0xff] %vm986_vm4, %v935_v17 }
 0x12f   : > { %v937_v18 = vpop.xlane.xlu0 %936 }
 0x130   : > { %994 = vst.msk [vmem:[%s1804_s25 + $0x38] sm:$0xff] %vm986_vm4, %v937_v18 }
 0x132   : > { %v939_v19 = vpop.xlane.xlu1 %938 }
 0x133   : > { %995 = vst.msk [vmem:[%s1804_s25 + $0x40] sm:$0xff] %vm986_vm4, %v939_v19 }
 0x135   : > { %v941_v20 = vpop.xlane.xlu0 %940 }
 0x136   : > { %996 = vst.msk [vmem:[%s1804_s25 + $0x48] sm:$0xff] %vm986_vm4, %v941_v20 }
 0x137   : > { %v943_v21 = vpop.xlane.xlu1 %942 }
 0x138   : > { %997 = vst.msk [vmem:[%s1804_s25 + $0x50] sm:$0xff] %vm986_vm4, %v943_v21 }
 0x13b   : > { %v945_v22 = vpop.xlane.xlu0 %944 }
 0x13c   : > { %998 = vst.msk [vmem:[%s1804_s25 + $0x58] sm:$0xff] %vm986_vm4, %v945_v22 }
 0x13d   : > { %v947_v23 = vpop.xlane.xlu1 %946 }
 0x13e   : > { %999 = vst.msk [vmem:[%s1804_s25 + $0x60] sm:$0xff] %vm986_vm4, %v947_v23 }
 0x140   : > { %v949_v24 = vpop.xlane.xlu0 %948 }
 0x141   : > { %1000 = vst.msk [vmem:[%s1804_s25 + $0x68] sm:$0xff] %vm986_vm4, %v949_v24 }
 0x142   : > { %v951_v7 = vpop.xlane.xlu1 %950 }
 0x143   : > { %1001 = vst.msk [vmem:[%s1804_s25 + $0x70] sm:$0xff] %vm986_vm4, %v951_v7 }
 0x146   : > { %v953_v25 = vpop.xlane.xlu0 %952 }
 0x147   : > { %1002 = vst.msk [vmem:[%s1804_s25 + $0x78] sm:$0xff] %vm986_vm4, %v953_v25 }
 0x148   : > { %v955_v29 = vpop.xlane.xlu1 %954 }
 0x149   : > { %1003 = vst.msk [vmem:[%s1804_s25 + $0x80] sm:$0xff] %vm986_vm4, %v955_v29 }
 0x14b   : > { %v957_v30 = vpop.xlane.xlu0 %956 }
 0x14c   : > { %1004 = vst.msk [vmem:[%s1804_s25 + $0x88] sm:$0xff] %vm986_vm4, %v957_v30 }
 0x14d   : > { %v959_v31 = vpop.xlane.xlu1 %958 }
 0x14e   : > { %1005 = vst.msk [vmem:[%s1804_s25 + $0x90] sm:$0xff] %vm986_vm4, %v959_v31 }
 0x151   : > { %v961_v32 = vpop.xlane.xlu0 %960 }
 0x152   : > { %1006 = vst.msk [vmem:[%s1804_s25 + $0x98] sm:$0xff] %vm986_vm4, %v961_v32 }
 0x153   : > { %v963_v16 = vpop.xlane.xlu1 %962 }
 0x154   : > { %1007 = vst.msk [vmem:[%s1804_s25 + $0xa0] sm:$0xff] %vm986_vm4, %v963_v16 }
 0x157   : > { %v965_v28 = vpop.xlane.xlu0 %964 }
 0x158   : > { %1008 = vst.msk [vmem:[%s1804_s25 + $0xa8] sm:$0xff] %vm986_vm4, %v965_v28 }
 0x159   : > { %v967_v33 = vpop.xlane.xlu1 %966 }
 0x15a   : > { %1009 = vst.msk [vmem:[%s1804_s25 + $0xb0] sm:$0xff] %vm986_vm4, %v967_v33 }
 0x15d   : > { %v969_v34 = vpop.xlane.xlu0 %968 }
 0x15e   : > { %1010 = vst.msk [vmem:[%s1804_s25 + $0xb8] sm:$0xff] %vm986_vm4, %v969_v34 }
 0x15f   : > { %v971_v35 = vpop.xlane.xlu1 %970 }
 0x160   : > { %1011 = vst.msk [vmem:[%s1804_s25 + $0xc0] sm:$0xff] %vm986_vm4, %v971_v35 }
 0x162   : > { %v973_v36 = vpop.xlane.xlu0 %972 }
 0x163   : > { %1012 = vst.msk [vmem:[%s1804_s25 + $0xc8] sm:$0xff] %vm986_vm4, %v973_v36 }
 0x165   : > { %v975_v26 = vpop.xlane.xlu1 %974 }
 0x166   : > { %1013 = vst.msk [vmem:[%s1804_s25 + $0xd0] sm:$0xff] %vm986_vm4, %v975_v26 }
 0x167   : > { %v977_v37 = vpop.xlane.xlu0 %976 }
 0x168   : > { %1014 = vst.msk [vmem:[%s1804_s25 + $0xd8] sm:$0xff] %vm986_vm4, %v977_v37 }
 0x16a   : > { %v979_v38 = vpop.xlane.xlu1 %978 }
 0x16b   : > { %1015 = vst.msk [vmem:[%s1804_s25 + $0xe0] sm:$0xff] %vm986_vm4, %v979_v38 }
 0x16c   : > { %v981_v27 = vpop.xlane.xlu0 %980 }
 0x16d   : > { %1016 = vst.msk [vmem:[%s1804_s25 + $0xe8] sm:$0xff] %vm986_vm4, %v981_v27 }
 0x16e   : > { %v983_v39 = vpop.xlane.xlu1 %982 }
 0x16f   : > { %1017 = vst.msk [vmem:[%s1804_s25 + $0xf0] sm:$0xff] %vm986_vm4, %v983_v39 }
 0x170   : > { %v985_v40 = vpop.xlane.xlu0 %984 }
 0x171   : > { %1018 = vst.msk [vmem:[%s1804_s25 + $0xf8] sm:$0xff] %vm986_vm4, %v985_v40 }
 0x172 PF: > { %s13_s12 = sadd.s32 1, %s1103_s12  }
 0x173   : > { %p10_p4 = scmp.ge.s32.totalorder %s13_s12, 4  }
 0x175   :  { %12 = sbr.rel (!%p10_p4) target bundleno = 1 (0x1), region = 62 }

</bundles_post_ra>
